<compile_context>
chip_gen: v7x
topology: tpu7x:2x2x1
jax: 0.10.0
libtpu: 0.0.40
codegen_flags: <defaults>
</compile_context>

<pallas_src>
import functools

import jax
import jax.numpy as jnp
from jax.experimental import pallas as pl
from jax.experimental.pallas import tpu as pltpu


def _round_up(x: int, m: int) -> int:
    return ((x + m - 1) // m) * m


def _choose_tile_and_pad(dim: int, target: int, align: int):
    """Pick a tile (multiple of `align`, bounded by ~target) plus the padded
    dim (multiple of the tile).  Never falls back to an unbounded full-extent
    block, so VMEM use stays bounded on every TPU generation."""
    dim_aligned = _round_up(dim, align)
    if dim_aligned <= target:
        return dim_aligned, dim_aligned
    # Prefer an aligned divisor of the (aligned) dim: no extra padding needed.
    t = (target // align) * align
    while t >= align:
        if dim_aligned % t == 0:
            return t, dim_aligned
        t -= align
    # Otherwise pad up to a multiple of the aligned target tile.
    t = (target // align) * align
    return t, _round_up(dim_aligned, t)


def res_linear_kernel(x_ref, w_ref, b_ref, o_ref, acc_ref, *, mm_dtype):
    """One (row-tile i, col-tile j, K-tile k) step of  out = x + x @ W + b
    (W already in (in, out) layout).

    x_ref:   (TR, TK)  x tile along the contraction dim; also the residual
                       slice when k == j (valid because TK == TN)
    w_ref:   (TK, TN)  weight tile, (in, out) layout
    b_ref:   (1,  TN)  bias tile
    o_ref:   (TR, TN)  output tile
    acc_ref: (TR, TN)  f32 accumulator (VMEM scratch, persists over k)
    """
    j = pl.program_id(1)
    k = pl.program_id(2)

    @pl.when(k == 0)
    def _init():
        # Bias folded into the accumulator init, exactly once per output tile.
        acc_ref[...] = jnp.broadcast_to(
            b_ref[...].astype(jnp.float32), acc_ref.shape)

    # Residual folded from the same x tile (exactly once per output tile),
    # kept in f32 regardless of the matmul operand dtype.
    @pl.when(k == j)
    def _residual():
        acc_ref[...] += x_ref[...].astype(jnp.float32)

    x_mm = x_ref[...]
    if mm_dtype is not None:
        x_mm = x_mm.astype(mm_dtype)   # in-kernel cast: no extra HBM pass
    acc_ref[...] += jnp.dot(x_mm, w_ref[...],
                            preferred_element_type=jnp.float32)

    @pl.when(k == pl.num_programs(2) - 1)
    def _finalize():
        o_ref[...] = acc_ref[...].astype(o_ref.dtype)


@functools.partial(jax.jit, static_argnames=("tr", "th", "matmul_dtype"))
def res_block_forward(x, w, b, *, tr=1024, th=1024, matmul_dtype=jnp.bfloat16):
    """resBlock(Linear(H, H)) forward:  x + x @ W^T + b.

    x: [B, S, H]; w: [H, H] torch Linear weight (out, in); b: [H].
    matmul_dtype: MXU operand dtype (default bf16 for v5e/v6e/v7x peak;
      residual/bias/accumulation stay f32).  Pass None for an exact f32 matmul.
    """
    B, S, H = x.shape
    R = B * S
    x2 = x.reshape(R, H)

    # Tiles: rows at 16 (bf16 sublane packing), H at 128 lanes; both capped
    # around 1024 so the double-buffered working set (~24 MiB at defaults)
    # fits v7x's 64 MiB VMEM while sitting above the v6e/v7x roofline knee.
    # TN == TK == TH so the residual can be folded from the k == j x tile.
    TR, R_pad = _choose_tile_and_pad(R, tr, 16)
    TH, H_pad = _choose_tile_and_pad(H, th, 128)

    # Zero-pad to tile multiples (exact: padded K rows/cols of W and x
    # contribute nothing; padded outputs are sliced off).  Keeps output
    # stores lane-dense (vst, not vst.msk).
    if (R_pad, H_pad) != (R, H):
        x2 = jnp.pad(x2, ((0, R_pad - R), (0, H_pad - H)))

    # One-time (in, out)-layout weight so the MXU sees a plain x @ W tile dot
    # (no per-tile XLU transpose).  W is cast in the wrapper (tiny, reused
    # R/TR times); x is cast per-tile inside the kernel.
    w_t = w.T
    if matmul_dtype is not None:
        w_t = w_t.astype(matmul_dtype)
    if H_pad != H:
        w_t = jnp.pad(w_t, ((0, H_pad - H), (0, H_pad - H)))
        b_p = jnp.pad(b, (0, H_pad - H))
    else:
        b_p = b
    b2 = b_p.reshape(1, H_pad)

    grid = (R_pad // TR, H_pad // TH, H_pad // TH)
    # TODO(synk): on v7x, if (R_pad//TR)*(H_pad//TH) is odd or 1 for a given
    # shape, rebalance the parallel extents so neither TensorCore idles.

    x_bytes = x2.dtype.itemsize
    w_bytes = w_t.dtype.itemsize
    out_bytes = x.dtype.itemsize

    # Double-buffered inputs/outputs + f32 accumulator, with headroom.
    vmem_est = (2 * TR * TH * x_bytes        # x double buffer
                + 2 * TH * TH * w_bytes      # W double buffer
                + 2 * TH * 4                 # bias
                + 2 * TR * TH * out_bytes    # output double buffer
                + TR * TH * 4)               # f32 accumulator
    vmem_limit = min(max(int(1.4 * vmem_est), 32 * 1024 * 1024),
                     112 * 1024 * 1024)

    n_row_tiles = R_pad // TR
    n_col_tiles = H_pad // TH
    cost = pl.CostEstimate(
        flops=2 * R_pad * H_pad * H_pad,
        transcendentals=0,
        bytes_accessed=(R_pad * H_pad * n_col_tiles * x_bytes    # x re-read per N tile
                        + H_pad * H_pad * n_row_tiles * w_bytes  # W re-read per row tile
                        + H_pad * 4                              # bias
                        + R_pad * H_pad * out_bytes))            # output write

    kernel = functools.partial(res_linear_kernel, mm_dtype=matmul_dtype)

    out2 = pl.pallas_call(
        kernel,
        out_shape=jax.ShapeDtypeStruct((R_pad, H_pad), x.dtype),
        grid_spec=pltpu.PrefetchScalarGridSpec(
            num_scalar_prefetch=0,
            grid=grid,
            in_specs=[
                # x tile along the contraction dim (also the residual slice
                # when k == j)
                pl.BlockSpec((TR, TH), lambda i, j, k: (i, k)),
                # (in, out)-layout weight tile
                pl.BlockSpec((TH, TH), lambda i, j, k: (k, j)),
                # bias tile
                pl.BlockSpec((1, TH), lambda i, j, k: (0, j)),
            ],
            out_specs=pl.BlockSpec((TR, TH), lambda i, j, k: (i, j)),
            scratch_shapes=[pltpu.VMEM((TR, TH), jnp.float32)],
        ),
        compiler_params=pltpu.CompilerParams(
            dimension_semantics=("parallel", "parallel", "arbitrary"),
            vmem_limit_bytes=vmem_limit,
        ),
        cost_estimate=cost,
    )(x2, w_t, b2)

    if (R_pad, H_pad) != (R, H):
        out2 = out2[:R, :H]
    return out2.reshape(B, S, H)


if __name__ == "__main__":
    key = jax.random.PRNGKey(0)
    k_x, k_w, k_b = jax.random.split(key, 3)

    B, S, H = 2, 8, 32
    x = jax.random.normal(k_x, (B, S, H), dtype=jnp.float32)

    # Deterministic "Linear(H, H)" parameter init (torch-style uniform bound).
    bound = 1.0 / jnp.sqrt(H)
    w = jax.random.uniform(k_w, (H, H), minval=-bound, maxval=bound,
                           dtype=jnp.float32)   # torch layout (out, in)
    b = jax.random.uniform(k_b, (H,), minval=-bound, maxval=bound,
                           dtype=jnp.float32)

    # Pure-JAX reference: x + Linear(x)
    ref = x + (jnp.einsum("bsh,oh->bso", x, w) + b)

    # Exact f32 path.
    out_f32 = jax.block_until_ready(
        res_block_forward(x, w, b, matmul_dtype=None))
    assert out_f32.shape == ref.shape
    assert jnp.allclose(out_f32, ref, atol=1e-5, rtol=1e-5), "f32 mismatch"

    # Default bf16 MXU-operand path (residual / bias / accumulation stay f32).
    out_bf16 = jax.block_until_ready(res_block_forward(x, w, b))
    assert out_bf16.shape == ref.shape
    assert jnp.allclose(out_bf16, ref, atol=5e-2, rtol=5e-2), "bf16 mismatch"

    print("KERNEL_OK")
</pallas_src>

<mosaic_0001>
module attributes {stable_mosaic.version = 11 : i64} {
  func.func @res_linear_kernel(%arg0: i32, %arg1: i32, %arg2: i32, %arg3: memref<16x128xf32, #tpu.memory_space<vmem>>, %arg4: memref<128x128xf32, #tpu.memory_space<vmem>>, %arg5: memref<1x128xf32, #tpu.memory_space<vmem>>, %arg6: memref<16x128xf32, #tpu.memory_space<vmem>>, %arg7: memref<16x128xf32, #tpu.memory_space<vmem>>) attributes {dimension_semantics = [#tpu.dimension_semantics<parallel>, #tpu.dimension_semantics<parallel>, #tpu.dimension_semantics<arbitrary>], iteration_bounds = array<i64: 1, 1, 1>, scalar_prefetch = 0 : i64, scratch_operands = 1 : i64, tpu.core_type = #tpu.core_type<tc>, window_params = [{transform_indices = @transform_0, window_bounds = array<i64: 16, 128>}, {transform_indices = @transform_1, window_bounds = array<i64: 128, 128>}, {transform_indices = @transform_2, window_bounds = array<i64: 1, 128>}, {transform_indices = @transform_3, window_bounds = array<i64: 16, 128>}]} {
    %c0_i32 = arith.constant 0 : i32
    %0 = arith.cmpi eq, %arg2, %c0_i32 : i32
    %1 = arith.extui %0 : i1 to i32
    %c0_i32_0 = arith.constant 0 : i32
    %2 = arith.cmpi ne, %1, %c0_i32_0 : i32
    scf.if %2 {
      %c0_11 = arith.constant 0 : index
      %c0_12 = arith.constant 0 : index
      %15 = vector.load %arg5[%c0_11, %c0_12] : memref<1x128xf32, #tpu.memory_space<vmem>>, vector<1x128xf32>
      %16 = vector.shape_cast %15 : vector<1x128xf32> to vector<1x128xf32>
      %17 = vector.broadcast %16 : vector<1x128xf32> to vector<16x128xf32>
      %c0_13 = arith.constant 0 : index
      %c0_14 = arith.constant 0 : index
      %18 = vector.load %arg7[%c0_13, %c0_14] : memref<16x128xf32, #tpu.memory_space<vmem>>, vector<16x128xf32>
      tpu.vector_store %arg7[%c0_13, %c0_14], %17 {strides = array<i32>} : memref<16x128xf32, #tpu.memory_space<vmem>>, vector<16x128xf32>,
    } else {
    }
    %3 = arith.cmpi eq, %arg2, %arg1 : i32
    %4 = arith.extui %3 : i1 to i32
    %c0_i32_1 = arith.constant 0 : i32
    %5 = arith.cmpi ne, %4, %c0_i32_1 : i32
    scf.if %5 {
      %c0_11 = arith.constant 0 : index
      %c0_12 = arith.constant 0 : index
      %15 = vector.load %arg7[%c0_11, %c0_12] : memref<16x128xf32, #tpu.memory_space<vmem>>, vector<16x128xf32>
      %c0_13 = arith.constant 0 : index
      %c0_14 = arith.constant 0 : index
      %16 = vector.load %arg3[%c0_13, %c0_14] : memref<16x128xf32, #tpu.memory_space<vmem>>, vector<16x128xf32>
      %17 = arith.addf %15, %16 : vector<16x128xf32>
      %c0_15 = arith.constant 0 : index
      %c0_16 = arith.constant 0 : index
      %18 = vector.load %arg7[%c0_15, %c0_16] : memref<16x128xf32, #tpu.memory_space<vmem>>, vector<16x128xf32>
      tpu.vector_store %arg7[%c0_15, %c0_16], %17 {strides = array<i32>} : memref<16x128xf32, #tpu.memory_space<vmem>>, vector<16x128xf32>,
    } else {
    }
    %c0 = arith.constant 0 : index
    %c0_2 = arith.constant 0 : index
    %6 = vector.load %arg3[%c0, %c0_2] : memref<16x128xf32, #tpu.memory_space<vmem>>, vector<16x128xf32>
    %c0_3 = arith.constant 0 : index
    %c0_4 = arith.constant 0 : index
    %7 = vector.load %arg7[%c0_3, %c0_4] : memref<16x128xf32, #tpu.memory_space<vmem>>, vector<16x128xf32>
    %c0_5 = arith.constant 0 : index
    %c0_6 = arith.constant 0 : index
    %8 = vector.load %arg4[%c0_5, %c0_6] : memref<128x128xf32, #tpu.memory_space<vmem>>, vector<128x128xf32>
    %cst = arith.constant dense<0.000000e+00> : vector<16x128xf32>
    %9 = tpu.matmul %6, %8, %cst {dimension_numbers = #tpu.dot_dimension_numbers<[1], [0], [0], [1], [0, 0, 1, 1], [], []>} : vector<16x128xf32>, vector<128x128xf32>, vector<16x128xf32> -> vector<16x128xf32>
    %10 = arith.addf %7, %9 : vector<16x128xf32>
    %c0_7 = arith.constant 0 : index
    %c0_8 = arith.constant 0 : index
    %11 = vector.load %arg7[%c0_7, %c0_8] : memref<16x128xf32, #tpu.memory_space<vmem>>, vector<16x128xf32>
    tpu.vector_store %arg7[%c0_7, %c0_8], %10 {strides = array<i32>} : memref<16x128xf32, #tpu.memory_space<vmem>>, vector<16x128xf32>,
    %c0_i32_9 = arith.constant 0 : i32
    %12 = arith.cmpi eq, %arg2, %c0_i32_9 : i32
    %13 = arith.extui %12 : i1 to i32
    %c0_i32_10 = arith.constant 0 : i32
    %14 = arith.cmpi ne, %13, %c0_i32_10 : i32
    scf.if %14 {
      %c0_11 = arith.constant 0 : index
      %c0_12 = arith.constant 0 : index
      %15 = vector.load %arg7[%c0_11, %c0_12] : memref<16x128xf32, #tpu.memory_space<vmem>>, vector<16x128xf32>
      %c0_13 = arith.constant 0 : index
      %c0_14 = arith.constant 0 : index
      %16 = vector.load %arg6[%c0_13, %c0_14] : memref<16x128xf32, #tpu.memory_space<vmem>>, vector<16x128xf32>
      tpu.vector_store %arg6[%c0_13, %c0_14], %15 {strides = array<i32>} : memref<16x128xf32, #tpu.memory_space<vmem>>, vector<16x128xf32>,
    } else {
    }
    return
  }
  func.func @transform_0(%arg0: i32, %arg1: i32, %arg2: i32) -> (i32, i32) {
    %c0_i32 = arith.constant 0 : i32
    return %arg0, %arg2 : i32, i32
  }
  func.func @transform_1(%arg0: i32, %arg1: i32, %arg2: i32) -> (i32, i32) {
    %c0_i32 = arith.constant 0 : i32
    return %arg2, %arg1 : i32, i32
  }
  func.func @transform_2(%arg0: i32, %arg1: i32, %arg2: i32) -> (i32, i32) {
    %c0_i32 = arith.constant 0 : i32
    %c0_i32_0 = arith.constant 0 : i32
    return %c0_i32, %arg1 : i32, i32
  }
  func.func @transform_3(%arg0: i32, %arg1: i32, %arg2: i32) -> (i32, i32) {
    %c0_i32 = arith.constant 0 : i32
    return %arg0, %arg1 : i32, i32
  }
}

</mosaic_0001>

<bundles_post_ra>
// kernel: res_block_forward.1
= control target key start
LH: loop header
LB: loop body
LE: loop exit
PB: predicated region body
PF: predicated region fallthrough
CT: control target
= control target key end

     0   :  { %s318_s1 = inlined_call_operand.vmem [shape: f32[128,128], index: 1, kind: input, shape index: {}]   ;;  %s319_s0 = inlined_call_operand.vmem [shape: f32[16,128], index: 0, kind: input, shape index: {}]   ;;  %s320_s2 = inlined_call_operand.vmem [shape: f32[1,128], index: 2, kind: input, shape index: {}]   ;;  %s321_s3 = inlined_call_operand.vmem [shape: f32[16,128], index: 3, kind: output, shape index: {}]  }
   0x1   :  { %v43_v0 = vld [vmem:[%s318_s1] sm:$0xff]  ;;  %v44_v1 = vld [vmem:[%s318_s1 + $0x8] sm:$0xff]  ;;  %v45_v2 = vld [vmem:[%s318_s1 + $0x10] sm:$0xff] }
   0x2   :  { %v203_v3 = vpack.c.bf16 %v44_v1, %v43_v0  ;;  %v46_v4 = vld [vmem:[%s318_s1 + $0x18] sm:$0xff]  ;;  %v47_v6 = vld [vmem:[%s318_s1 + $0x20] sm:$0xff]  ;;  %v48_v7 = vld [vmem:[%s318_s1 + $0x28] sm:$0xff] }
   0x3   :  { %v207_v5 = vpack.c.bf16 %v46_v4, %v45_v2  ;;  %v211_v8 = vpack.c.bf16 %v48_v7, %v47_v6  ;;  %v39_v9 = vld [vmem:[%s319_s0] sm:$0xff]  ;;  %v49_v10 = vld [vmem:[%s318_s1 + $0x30] sm:$0xff]  ;;  %v50_v11 = vld [vmem:[%s318_s1 + $0x38] sm:$0xff] }
   0x4   :  { %204 = vmatprep.subr.bf16.mxu0 %v203_v3  ;;  %200 = vmatprep.mubr.f32.mxu0 %v39_v9  ;;  %v215_v12 = vpack.c.bf16 %v50_v11, %v49_v10  ;;  %v51_v13 = vld [vmem:[%s318_s1 + $0x40] sm:$0xff]  ;;  %v52_v14 = vld [vmem:[%s318_s1 + $0x48] sm:$0xff]  ;;  %v53_v16 = vld [vmem:[%s318_s1 + $0x50] sm:$0xff] }
   0x5   :  { %206 = vmatpush3.bf16.msra.mxu0 %v203_v3  ;;  %v219_v15 = vpack.c.bf16 %v52_v14, %v51_v13  ;;  %v54_v17 = vld [vmem:[%s318_s1 + $0x58] sm:$0xff]  ;;  %v55_v19 = vld [vmem:[%s318_s1 + $0x60] sm:$0xff]  ;;  %v56_v20 = vld [vmem:[%s318_s1 + $0x68] sm:$0xff] }
   0x6   :  { %208 = vmatprep.subr.bf16.mxu0 %v207_v5  ;;  %v223_v18 = vpack.c.bf16 %v54_v17, %v53_v16  ;;  %v227_v21 = vpack.c.bf16 %v56_v20, %v55_v19  ;;  %v57_v22 = vld [vmem:[%s318_s1 + $0x70] sm:$0xff]  ;;  %v58_v23 = vld [vmem:[%s318_s1 + $0x78] sm:$0xff]  ;;  %v40_v25 = vld [vmem:[%s319_s0 + $0x8] sm:$0xff] }
   0x7   :  { %v231_v24 = vpack.c.bf16 %v58_v23, %v57_v22  ;;  %v149_v26 = vld [vmem:[%s320_s2] ss:$0 sm:$0xff] }
   0x8   :  { %v36_v27 = vadd.f32 %v149_v26, %v40_v25  ;;  %v35_v28 = vadd.f32 %v149_v26, %v39_v9 }
   0x9   :  { %210 = vmatpush3.bf16.msra.mxu0 %v207_v5 }
   0xa   :  { %212 = vmatprep.subr.bf16.mxu0 %v211_v8 }
   0xd   :  { %214 = vmatpush3.bf16.msra.mxu0 %v211_v8 }
   0xe   :  { %216 = vmatprep.subr.bf16.mxu0 %v215_v12 }
  0x11   :  { %218 = vmatpush3.bf16.msra.mxu0 %v215_v12 }
  0x12   :  { %220 = vmatprep.subr.bf16.mxu0 %v219_v15 }
  0x15   :  { %222 = vmatpush3.bf16.msra.mxu0 %v219_v15 }
  0x16   :  { %224 = vmatprep.subr.bf16.mxu0 %v223_v18 }
  0x19   :  { %226 = vmatpush3.bf16.msra.mxu0 %v223_v18 }
  0x1a   :  { %228 = vmatprep.subr.bf16.mxu0 %v227_v21 }
  0x1d   :  { %230 = vmatpush3.bf16.msra.mxu0 %v227_v21 }
  0x1e   :  { %232 = vmatprep.subr.bf16.mxu0 %v231_v24 }
  0x21   :  { %234 = vmatpush3.bf16.msra.mxu0 %v231_v24 }
  0x24   :  { %201 = vmatmul.mubr.f32.vlgmr.msra.gmra.mrb[0].mxu0 %v40_v25 }
  0xf7   :  { %v202_v29 = vpop.f32.mrb[0].mxu0 }
  0xf8   :  { %v135_v30 = vadd.f32 %v202_v29, %v36_v27  ;;  %v125_v31 = vpop.f32.mrb[1].mxu0 }
  0xf9   :  { %v134_v32 = vadd.f32 %v125_v31, %v35_v28 }
  0xfa   :  { %144 = vst [vmem:[%s321_s3 + $0x8] sm:$0xff] %v135_v30 }
  0xfb   :  { %143 = vst [vmem:[%s321_s3] sm:$0xff] %v134_v32 }

</bundles_post_ra>
